<compile_context>
chip_gen: v6e
topology: v6e:2x2x1
jax: 0.10.0
libtpu: 0.0.40
codegen_flags: <defaults>
</compile_context>

<pallas_src>
import math
import numpy as np
import jax
import jax.numpy as jnp
from jax.experimental import pallas as pl
from jax.experimental.pallas import tpu as pltpu


def _cdiv(a: int, b: int) -> int:
    return -(-a // b)


def _round_up(x: int, m: int) -> int:
    return _cdiv(x, m) * m


def _choose_tiling(M: int, E: int, requested_tm, out_itemsize: int):
    """Pick (tm, grid, M_pad, vmem_limit_bytes) per generation."""
    E2 = E * E
    try:
        vmem_cap = int(pltpu.get_tpu_info().vmem_capacity_bytes)
    except Exception:  # pragma: no cover - conservative fallback (v7x-sized VMEM)
        vmem_cap = 64 << 20

    # Per-row VMEM footprint of one grid step: double-buffered coord + output tiles,
    # plus the (E, tm) y-basis scratch and slack for live intermediates.
    bytes_per_row = 2 * (2 * 4 + E2 * out_itemsize) + 4 * (E + 4)
    vmem_budget = min(vmem_cap // 4, 28 << 20)
    tm_cap = max(128, (vmem_budget // bytes_per_row) // 128 * 128)

    if requested_tm is None:
        # 64-MiB-VMEM chips (v7x) have ~3x the HBM BW -> need bigger tiles to amortize
        # the ~0.35 us per-step pipeline overhead; 128-MiB chips saturate HBM sooner.
        requested_tm = 16384 if vmem_cap <= (64 << 20) else 8192

    tm = max(128, min(int(requested_tm), tm_cap) // 128 * 128)
    m_rounded = _round_up(max(M, 1), 128)
    tm = min(tm, m_rounded)

    grid = _cdiv(m_rounded, tm)
    if grid == 1 and m_rounded >= 2048:
        grid = 2  # let the 'parallel' grid axis shard across two TensorCores (v7x)

    # Re-balance the tile so padding waste is below one 128-lane chunk per tile.
    tm = _round_up(_cdiv(M, grid), 128)
    grid = _cdiv(M, tm)
    m_pad = grid * tm

    footprint = bytes_per_row * tm
    vmem_limit = int(min(vmem_cap // 2, max(footprint + (4 << 20), 16 << 20)))
    return tm, grid, m_pad, vmem_limit


def _ope_kernel(E: int, max_freq: int, omega: float):
    """coords (2, tm) -> out (E^2, tm); y-basis staged through a small VMEM scratch."""
    sqrt2 = math.sqrt(2.0)

    def basis_rows(t):
        # Row k of the basis, each as a (1, tm) value:
        #   b_0 = 1 ; b_{2k-1} = sqrt(2) cos(k*omega*t) ; b_{2k} = sqrt(2) sin(k*omega*t)
        # Only cos/sin of the fundamental hit the transcendental path; higher
        # harmonics use the angle-addition (Chebyshev) recurrence: 2 FMAs each.
        rows = [jnp.ones_like(t)]
        if max_freq >= 1:
            ang = t * omega
            c1 = jnp.cos(ang)
            s1 = jnp.sin(ang)
            rows += [sqrt2 * c1, sqrt2 * s1]
            two_c1 = c1 + c1
            ckm2, skm2 = jnp.ones_like(t), jnp.zeros_like(t)
            ckm1, skm1 = c1, s1
            for _ in range(2, max_freq + 1):
                ck = two_c1 * ckm1 - ckm2
                sk = two_c1 * skm1 - skm2
                rows += [sqrt2 * ck, sqrt2 * sk]
                ckm2, skm2, ckm1, skm1 = ckm1, skm1, ck, sk
        return rows

    def kernel(coords_ref, out_ref, ybasis_ref):
        # coords_ref: (2, tm) ; out_ref: (E^2, tm) ; ybasis_ref: (E, tm) VMEM scratch
        x = coords_ref[0:1, :]
        y = coords_ref[1:2, :]

        xb = basis_rows(x)                      # list of E (1, tm) values
        yb = basis_rows(y)
        for j in range(E):                      # stage y-basis as an (E, tm) slab
            ybasis_ref[j:j + 1, :] = yb[j]
        ey = ybasis_ref[...]                    # (E, tm)

        # out[i*E + j, :] = xb[i] * ey[j, :]  -- E strips of E rows, pure VPU multiplies.
        for i in range(E):
            out_ref[i * E:(i + 1) * E, :] = (xb[i] * ey).astype(out_ref.dtype)

    return kernel


def ope_forward_slab(coords: jax.Array, max_freq: int, omega: float, *,
                     tm=None, out_dtype=jnp.float32) -> jax.Array:
    """coords (N, bsize, 2) -> lane-dense slab (E^2, M_pad); only the first N*bsize
    columns are valid. Consumers that feed a projection matmul should contract this
    slab directly (e.g. jnp.dot(W, slab)) instead of going through ope_forward()."""
    N, bsize, two = coords.shape
    assert two == 2
    E = 2 * max_freq + 1
    E2 = E * E
    M = N * bsize

    out_itemsize = jnp.dtype(out_dtype).itemsize
    tm, grid, M_pad, vmem_limit = _choose_tiling(M, E, tm, out_itemsize)

    coords_t = coords.reshape(M, 2).astype(jnp.float32).T       # (2, M) lane-dense slab
    if M_pad != M:
        coords_t = jnp.pad(coords_t, ((0, 0), (0, M_pad - M)))

    cost = pl.CostEstimate(
        flops=M_pad * (E2 + 8 * max_freq + 6),
        transcendentals=4 * M_pad,
        bytes_accessed=2 * 4 * M_pad + E2 * out_itemsize * M_pad,
    )

    return pl.pallas_call(
        _ope_kernel(E, max_freq, float(omega)),
        out_shape=jax.ShapeDtypeStruct((E2, M_pad), out_dtype),
        grid_spec=pltpu.PrefetchScalarGridSpec(
            num_scalar_prefetch=0,
            grid=(grid,),
            in_specs=[pl.BlockSpec((2, tm), lambda i: (0, i))],
            out_specs=pl.BlockSpec((E2, tm), lambda i: (0, i)),
            scratch_shapes=[pltpu.VMEM((E, tm), jnp.float32)],
        ),
        compiler_params=pltpu.CompilerParams(
            dimension_semantics=("parallel",),
            vmem_limit_bytes=vmem_limit,
        ),
        cost_estimate=cost,
    )(coords_t)


def ope_forward(coords: jax.Array, max_freq: int, omega: float, *, tm=None) -> jax.Array:
    """Original module semantics: (N, bsize, 2) -> (N, bsize, (2*max_freq+1)^2).

    NOTE: the final transpose re-streams the whole output through HBM; performance
    critical callers should use ope_forward_slab() and consume the slab directly."""
    N, bsize, _ = coords.shape
    E2 = (2 * max_freq + 1) ** 2
    M = N * bsize
    slab = ope_forward_slab(coords, max_freq, omega, tm=tm)
    return slab[:, :M].T.reshape(N, bsize, E2)


def ope_reference(coords: jax.Array, max_freq: int, omega: float) -> jax.Array:
    """Pure-JAX mirror of the PyTorch forward (for correctness checking)."""
    x = coords[..., 0:1] * omega
    y = coords[..., 1:2] * omega

    def embed(t):
        parts = [jnp.ones_like(t)]
        for i in range(1, max_freq + 1):
            parts.append(math.sqrt(2.0) * jnp.cos(t * i))
            parts.append(math.sqrt(2.0) * jnp.sin(t * i))
        return jnp.concatenate(parts, axis=-1)  # (N, bsize, E)

    X = embed(x)
    Y = embed(y)
    ope_mat = X[..., :, None] * Y[..., None, :]  # (N, bsize, E, E)
    return ope_mat.reshape(coords.shape[0], coords.shape[1], -1)


if __name__ == "__main__":
    max_freq = 3      # -> E = 7, output dim 49
    omega = 0.5
    N, bsize = 2, 8

    key = jax.random.PRNGKey(0)
    coords = jax.random.uniform(key, (N, bsize, 2), dtype=jnp.float32,
                                minval=-1.0, maxval=1.0)

    out = ope_forward(coords, max_freq, omega)
    out = jax.block_until_ready(out)

    ref = ope_reference(coords, max_freq, omega)
    assert out.shape == (N, bsize, (2 * max_freq + 1) ** 2)
    np.testing.assert_allclose(np.asarray(out), np.asarray(ref), rtol=1e-5, atol=1e-5)

    print("KERNEL_OK")
</pallas_src>

<mosaic_0001>
module attributes {stable_mosaic.version = 11 : i64} {
  func.func @kernel(%arg0: i32, %arg1: memref<2x128xf32, #tpu.memory_space<vmem>>, %arg2: memref<49x128xf32, #tpu.memory_space<vmem>>, %arg3: memref<7x128xf32, #tpu.memory_space<vmem>>) attributes {dimension_semantics = [#tpu.dimension_semantics<parallel>], iteration_bounds = array<i64: 1>, scalar_prefetch = 0 : i64, scratch_operands = 1 : i64, tpu.core_type = #tpu.core_type<tc>, window_params = [{transform_indices = @transform_0, window_bounds = array<i64: 2, 128>}, {transform_indices = @transform_1, window_bounds = array<i64: 49, 128>}]} {
    %c0 = arith.constant 0 : index
    %c0_0 = arith.constant 0 : index
    %0 = vector.load %arg1[%c0, %c0_0] : memref<2x128xf32, #tpu.memory_space<vmem>>, vector<1x128xf32>
    %c1 = arith.constant 1 : index
    %c0_1 = arith.constant 0 : index
    %1 = vector.load %arg1[%c1, %c0_1] : memref<2x128xf32, #tpu.memory_space<vmem>>, vector<1x128xf32>
    %cst = arith.constant 1.000000e+00 : f32
    %2 = vector.broadcast %cst : f32 to vector<1x128xf32>
    %cst_2 = arith.constant 5.000000e-01 : f32
    %3 = vector.broadcast %cst_2 : f32 to vector<1x128xf32>
    %4 = arith.mulf %0, %3 : vector<1x128xf32>
    %5 = math.cos %4 : vector<1x128xf32>
    %6 = math.sin %4 : vector<1x128xf32>
    %cst_3 = arith.constant 1.41421354 : f32
    %7 = vector.broadcast %cst_3 : f32 to vector<1x128xf32>
    %8 = arith.mulf %7, %5 : vector<1x128xf32>
    %cst_4 = arith.constant 1.41421354 : f32
    %9 = vector.broadcast %cst_4 : f32 to vector<1x128xf32>
    %10 = arith.mulf %9, %6 : vector<1x128xf32>
    %11 = arith.addf %5, %5 : vector<1x128xf32>
    %cst_5 = arith.constant 1.000000e+00 : f32
    %12 = vector.broadcast %cst_5 : f32 to vector<1x128xf32>
    %cst_6 = arith.constant 0.000000e+00 : f32
    %13 = vector.broadcast %cst_6 : f32 to vector<1x128xf32>
    %14 = arith.mulf %11, %5 : vector<1x128xf32>
    %15 = arith.subf %14, %12 : vector<1x128xf32>
    %16 = arith.mulf %11, %6 : vector<1x128xf32>
    %17 = arith.subf %16, %13 : vector<1x128xf32>
    %cst_7 = arith.constant 1.41421354 : f32
    %18 = vector.broadcast %cst_7 : f32 to vector<1x128xf32>
    %19 = arith.mulf %18, %15 : vector<1x128xf32>
    %cst_8 = arith.constant 1.41421354 : f32
    %20 = vector.broadcast %cst_8 : f32 to vector<1x128xf32>
    %21 = arith.mulf %20, %17 : vector<1x128xf32>
    %22 = arith.mulf %11, %15 : vector<1x128xf32>
    %23 = arith.subf %22, %5 : vector<1x128xf32>
    %24 = arith.mulf %11, %17 : vector<1x128xf32>
    %25 = arith.subf %24, %6 : vector<1x128xf32>
    %cst_9 = arith.constant 1.41421354 : f32
    %26 = vector.broadcast %cst_9 : f32 to vector<1x128xf32>
    %27 = arith.mulf %26, %23 : vector<1x128xf32>
    %cst_10 = arith.constant 1.41421354 : f32
    %28 = vector.broadcast %cst_10 : f32 to vector<1x128xf32>
    %29 = arith.mulf %28, %25 : vector<1x128xf32>
    %cst_11 = arith.constant 1.000000e+00 : f32
    %30 = vector.broadcast %cst_11 : f32 to vector<1x128xf32>
    %cst_12 = arith.constant 5.000000e-01 : f32
    %31 = vector.broadcast %cst_12 : f32 to vector<1x128xf32>
    %32 = arith.mulf %1, %31 : vector<1x128xf32>
    %33 = math.cos %32 : vector<1x128xf32>
    %34 = math.sin %32 : vector<1x128xf32>
    %cst_13 = arith.constant 1.41421354 : f32
    %35 = vector.broadcast %cst_13 : f32 to vector<1x128xf32>
    %36 = arith.mulf %35, %33 : vector<1x128xf32>
    %cst_14 = arith.constant 1.41421354 : f32
    %37 = vector.broadcast %cst_14 : f32 to vector<1x128xf32>
    %38 = arith.mulf %37, %34 : vector<1x128xf32>
    %39 = arith.addf %33, %33 : vector<1x128xf32>
    %cst_15 = arith.constant 1.000000e+00 : f32
    %40 = vector.broadcast %cst_15 : f32 to vector<1x128xf32>
    %cst_16 = arith.constant 0.000000e+00 : f32
    %41 = vector.broadcast %cst_16 : f32 to vector<1x128xf32>
    %42 = arith.mulf %39, %33 : vector<1x128xf32>
    %43 = arith.subf %42, %40 : vector<1x128xf32>
    %44 = arith.mulf %39, %34 : vector<1x128xf32>
    %45 = arith.subf %44, %41 : vector<1x128xf32>
    %cst_17 = arith.constant 1.41421354 : f32
    %46 = vector.broadcast %cst_17 : f32 to vector<1x128xf32>
    %47 = arith.mulf %46, %43 : vector<1x128xf32>
    %cst_18 = arith.constant 1.41421354 : f32
    %48 = vector.broadcast %cst_18 : f32 to vector<1x128xf32>
    %49 = arith.mulf %48, %45 : vector<1x128xf32>
    %50 = arith.mulf %39, %43 : vector<1x128xf32>
    %51 = arith.subf %50, %33 : vector<1x128xf32>
    %52 = arith.mulf %39, %45 : vector<1x128xf32>
    %53 = arith.subf %52, %34 : vector<1x128xf32>
    %cst_19 = arith.constant 1.41421354 : f32
    %54 = vector.broadcast %cst_19 : f32 to vector<1x128xf32>
    %55 = arith.mulf %54, %51 : vector<1x128xf32>
    %cst_20 = arith.constant 1.41421354 : f32
    %56 = vector.broadcast %cst_20 : f32 to vector<1x128xf32>
    %57 = arith.mulf %56, %53 : vector<1x128xf32>
    %c0_21 = arith.constant 0 : index
    %c0_22 = arith.constant 0 : index
    %58 = vector.load %arg3[%c0_21, %c0_22] : memref<7x128xf32, #tpu.memory_space<vmem>>, vector<1x128xf32>
    tpu.vector_store %arg3[%c0_21, %c0_22], %30 {strides = array<i32>} : memref<7x128xf32, #tpu.memory_space<vmem>>, vector<1x128xf32>,
    %c1_23 = arith.constant 1 : index
    %c0_24 = arith.constant 0 : index
    %59 = vector.load %arg3[%c1_23, %c0_24] : memref<7x128xf32, #tpu.memory_space<vmem>>, vector<1x128xf32>
    tpu.vector_store %arg3[%c1_23, %c0_24], %36 {strides = array<i32>} : memref<7x128xf32, #tpu.memory_space<vmem>>, vector<1x128xf32>,
    %c2 = arith.constant 2 : index
    %c0_25 = arith.constant 0 : index
    %60 = vector.load %arg3[%c2, %c0_25] : memref<7x128xf32, #tpu.memory_space<vmem>>, vector<1x128xf32>
    tpu.vector_store %arg3[%c2, %c0_25], %38 {strides = array<i32>} : memref<7x128xf32, #tpu.memory_space<vmem>>, vector<1x128xf32>,
    %c3 = arith.constant 3 : index
    %c0_26 = arith.constant 0 : index
    %61 = vector.load %arg3[%c3, %c0_26] : memref<7x128xf32, #tpu.memory_space<vmem>>, vector<1x128xf32>
    tpu.vector_store %arg3[%c3, %c0_26], %47 {strides = array<i32>} : memref<7x128xf32, #tpu.memory_space<vmem>>, vector<1x128xf32>,
    %c4 = arith.constant 4 : index
    %c0_27 = arith.constant 0 : index
    %62 = vector.load %arg3[%c4, %c0_27] : memref<7x128xf32, #tpu.memory_space<vmem>>, vector<1x128xf32>
    tpu.vector_store %arg3[%c4, %c0_27], %49 {strides = array<i32>} : memref<7x128xf32, #tpu.memory_space<vmem>>, vector<1x128xf32>,
    %c5 = arith.constant 5 : index
    %c0_28 = arith.constant 0 : index
    %63 = vector.load %arg3[%c5, %c0_28] : memref<7x128xf32, #tpu.memory_space<vmem>>, vector<1x128xf32>
    tpu.vector_store %arg3[%c5, %c0_28], %55 {strides = array<i32>} : memref<7x128xf32, #tpu.memory_space<vmem>>, vector<1x128xf32>,
    %c6 = arith.constant 6 : index
    %c0_29 = arith.constant 0 : index
    %64 = vector.load %arg3[%c6, %c0_29] : memref<7x128xf32, #tpu.memory_space<vmem>>, vector<1x128xf32>
    tpu.vector_store %arg3[%c6, %c0_29], %57 {strides = array<i32>} : memref<7x128xf32, #tpu.memory_space<vmem>>, vector<1x128xf32>,
    %c0_30 = arith.constant 0 : index
    %c0_31 = arith.constant 0 : index
    %65 = vector.load %arg3[%c0_30, %c0_31] : memref<7x128xf32, #tpu.memory_space<vmem>>, vector<7x128xf32>
    %66 = vector.broadcast %2 : vector<1x128xf32> to vector<7x128xf32>
    %67 = arith.mulf %66, %65 : vector<7x128xf32>
    %c0_32 = arith.constant 0 : index
    %c0_33 = arith.constant 0 : index
    %68 = vector.load %arg2[%c0_32, %c0_33] : memref<49x128xf32, #tpu.memory_space<vmem>>, vector<7x128xf32>
    tpu.vector_store %arg2[%c0_32, %c0_33], %67 {strides = array<i32>} : memref<49x128xf32, #tpu.memory_space<vmem>>, vector<7x128xf32>,
    %69 = vector.broadcast %8 : vector<1x128xf32> to vector<7x128xf32>
    %70 = arith.mulf %69, %65 : vector<7x128xf32>
    %c7 = arith.constant 7 : index
    %c0_34 = arith.constant 0 : index
    %71 = vector.load %arg2[%c7, %c0_34] : memref<49x128xf32, #tpu.memory_space<vmem>>, vector<7x128xf32>
    tpu.vector_store %arg2[%c7, %c0_34], %70 {strides = array<i32>} : memref<49x128xf32, #tpu.memory_space<vmem>>, vector<7x128xf32>,
    %72 = vector.broadcast %10 : vector<1x128xf32> to vector<7x128xf32>
    %73 = arith.mulf %72, %65 : vector<7x128xf32>
    %c14 = arith.constant 14 : index
    %c0_35 = arith.constant 0 : index
    %74 = vector.load %arg2[%c14, %c0_35] : memref<49x128xf32, #tpu.memory_space<vmem>>, vector<7x128xf32>
    tpu.vector_store %arg2[%c14, %c0_35], %73 {strides = array<i32>} : memref<49x128xf32, #tpu.memory_space<vmem>>, vector<7x128xf32>,
    %75 = vector.broadcast %19 : vector<1x128xf32> to vector<7x128xf32>
    %76 = arith.mulf %75, %65 : vector<7x128xf32>
    %c21 = arith.constant 21 : index
    %c0_36 = arith.constant 0 : index
    %77 = vector.load %arg2[%c21, %c0_36] : memref<49x128xf32, #tpu.memory_space<vmem>>, vector<7x128xf32>
    tpu.vector_store %arg2[%c21, %c0_36], %76 {strides = array<i32>} : memref<49x128xf32, #tpu.memory_space<vmem>>, vector<7x128xf32>,
    %78 = vector.broadcast %21 : vector<1x128xf32> to vector<7x128xf32>
    %79 = arith.mulf %78, %65 : vector<7x128xf32>
    %c28 = arith.constant 28 : index
    %c0_37 = arith.constant 0 : index
    %80 = vector.load %arg2[%c28, %c0_37] : memref<49x128xf32, #tpu.memory_space<vmem>>, vector<7x128xf32>
    tpu.vector_store %arg2[%c28, %c0_37], %79 {strides = array<i32>} : memref<49x128xf32, #tpu.memory_space<vmem>>, vector<7x128xf32>,
    %81 = vector.broadcast %27 : vector<1x128xf32> to vector<7x128xf32>
    %82 = arith.mulf %81, %65 : vector<7x128xf32>
    %c35 = arith.constant 35 : index
    %c0_38 = arith.constant 0 : index
    %83 = vector.load %arg2[%c35, %c0_38] : memref<49x128xf32, #tpu.memory_space<vmem>>, vector<7x128xf32>
    tpu.vector_store %arg2[%c35, %c0_38], %82 {strides = array<i32>} : memref<49x128xf32, #tpu.memory_space<vmem>>, vector<7x128xf32>,
    %84 = vector.broadcast %29 : vector<1x128xf32> to vector<7x128xf32>
    %85 = arith.mulf %84, %65 : vector<7x128xf32>
    %c42 = arith.constant 42 : index
    %c0_39 = arith.constant 0 : index
    %86 = vector.load %arg2[%c42, %c0_39] : memref<49x128xf32, #tpu.memory_space<vmem>>, vector<7x128xf32>
    tpu.vector_store %arg2[%c42, %c0_39], %85 {strides = array<i32>} : memref<49x128xf32, #tpu.memory_space<vmem>>, vector<7x128xf32>,
    return
  }
  func.func @transform_0(%arg0: i32) -> (i32, i32) {
    %c0_i32 = arith.constant 0 : i32
    %c0_i32_0 = arith.constant 0 : i32
    return %c0_i32, %arg0 : i32, i32
  }
  func.func @transform_1(%arg0: i32) -> (i32, i32) {
    %c0_i32 = arith.constant 0 : i32
    %c0_i32_0 = arith.constant 0 : i32
    return %c0_i32, %arg0 : i32, i32
  }
}

</mosaic_0001>

<bundles_post_ra>
// kernel: tpu_custom_call.1
= control target key start
LH: loop header
LB: loop body
LE: loop exit
PB: predicated region body
PF: predicated region fallthrough
CT: control target
= control target key end

     0   :  { %6 = vsyncpa [#allocation4], 0  ;;  %s721_s0 = inlined_call_operand.hbm [shape: f32[2,128], index: 0, kind: input, shape index: {}]   ;;  %s722_s1 = inlined_call_operand.hbm [shape: f32[49,128], index: 1, kind: output, shape index: {}]  }
   0x1   :  { %7 = vsyncpa [#allocation5], 0  ;;  %s618_s6 = smov [#allocation3]  }
   0x2   :  { %s14_s7 = sshll.u32 %s618_s6, 4  ;;  %s15_s7 = int_to_ptr.vmem [resolvable:$true] %s14_s7 }
   0x3   :  { %s582_s8 = scalar_lea.vmem %s15_s7, 32  ;;  %p587_p1 = scmp.lt.s32.totalorder %s15_s7, %s15_s7 }
   0x4   :  { %p583_p0 = scmp.ne.s32.totalorder %s15_s7, %s582_s8  ;;  %p588_p2 = scmp.lt.s32.totalorder %s582_s8, %s582_s8 }
   0x6   :  { %p589_p3 = por %p588_p2, %p587_p1 }
   0x8   :  { %p590_p4 = pnand %p589_p3, %p583_p0 }
   0xa   :  { %593 = shalt.err (!%p590_p4)
}
   0xb   :  { %17 = dma.hbm_to_vmem [thread:$0]  %s721_s0, 32, %s15_s7, [#allocation4]  }
   0xc   :  { %614 = dma.done.wait [#allocation4], 32  }
   0xd   :  { %615 = vsyncadd [#allocation4], 4294967264  ;;  %v619_v0 = vmov 1.0   ;;  %v22_v1 = vld [vmem:[#allocation3 + $0x1] sm:$0x1]  ;;  %s626_s0 = smov [#allocation6]  }
   0xe   :  { %467 = vst [vmem:[#allocation2] sm:$0x1] %v619_v0  ;;  %v21_v2 = vld [vmem:[#allocation3] sm:$0x1]  ;;  %v642_v3 = vmul.f32 0.5, %v22_v1  ;;  %s517_s11 = sshll.u32 %s626_s0, 4  ;;  %s518_s11 = int_to_ptr.vmem [resolvable:$true] %s517_s11 }
   0xf   :  { %v644_v4 = vmul.f32 0.5, %v21_v2  ;;  %v620_v27 = vmov 683565275   ;;  %v621_v29 = vmov 2475754826   ;;  %s594_s12 = scalar_lea.vmem %s518_s11, 896  ;;  %p599_p6 = scmp.lt.s32.totalorder %s518_s11, %s518_s11 }
  0x10   :  { %v246_v5 = vand.u32 2147483647, %v642_v3  ;;  %v249_v6 = vand.u32 2139095040, %v642_v3  ;;  %v622_v31 = vmov 2131351028   ;;  %vm248_vm14 = vcmp.lt.s32.totalorder %v642_v3, 0  ;;  %p595_p5 = scmp.ne.s32.totalorder %s518_s11, %s594_s12  ;;  %p600_p7 = scmp.lt.s32.totalorder %s594_s12, %s594_s12 }
  0x11   :  { %v24_v7 = vand.u32 2147483647, %v644_v4  ;;  %v27_v8 = vand.u32 2139095040, %v644_v4  ;;  %v623_v33 = vmov 2102212464  }
  0x12   :  { %v250_v9 = vshrl.u32 %v249_v6, 23  ;;  %v253_v10 = vand.u32 8388607, %v246_v5  ;;  %v624_v35 = vmov 920167782   ;;  %p601_p8 = por %p600_p7, %p599_p6 }
  0x13   :  { %v28_v11 = vshrl.u32 %v27_v8, 23  ;;  %v31_v12 = vand.u32 8388607, %v24_v7  ;;  %v625_v43 = vmov 1326507024  }
  0x14   :  { %v538_v13 = vadd.s32 4294967169, %v250_v9  ;;  %v254_v16 = vor.u32 8388608, %v253_v10  ;;  %vm247_vm15 = vcmp.le.f32.partialorder %v246_v5, 0.7853982  ;;  %p602_p9 = pnand %p601_p8, %p595_p5 }
  0x15   :  { %v529_v14 = vadd.s32 4294967169, %v28_v11  ;;  %v32_v17 = vor.u32 8388608, %v31_v12 }
  0x16   :  { %v256_v15 = vadd.s32 1, %v538_v13  ;;  %v654_v23 = vshll.u32 %v254_v16, 8 }
  0x17   :  { %v34_v18 = vadd.s32 1, %v529_v14  ;;  %v656_v25 = vshll.u32 %v32_v17, 8 }
  0x18   :  { %vm257_vm0 = vcmp.gt.s32.totalorder %v256_v15, 0 }
  0x19   :  { %v258_v19 = vsel %vm257_vm0, %v256_v15, 0  ;;  %vm35_vm1 = vcmp.gt.s32.totalorder %v34_v18, 0  ;;  %vm26_vm0 = vcmp.lt.s32.totalorder %v644_v4, 0 }
  0x1a   :  { %v259_v20 = vshrl.u32 %v258_v19, 5  ;;  %v260_v21 = vand.u32 31, %v258_v19  ;;  %v36_v22 = vsel %vm35_vm1, %v34_v18, 0  ;;  %vm25_vm1 = vcmp.le.f32.partialorder %v24_v7, 0.7853982 }
  0x1b   :  { %v38_v24 = vand.u32 31, %v36_v22  ;;  %v658_v37 = vshrl.u32 %v36_v22, 5 }
  0x1c   :  { %v261_v26 = vsub.s32 32, %v260_v21  ;;  %v263_v28 = vshll.u32 %v620_v27, %v260_v21  ;;  %v266_v30 = vshll.u32 %v621_v29, %v260_v21  ;;  %v269_v32 = vshll.u32 %v622_v31, %v260_v21 }
  0x1d   :  { %v272_v34 = vshll.u32 %v623_v33, %v260_v21  ;;  %v275_v36 = vshll.u32 %v624_v35, %v260_v21  ;;  %vm278_vm2 = vcmp.lt.s32.totalorder %v259_v20, 1  ;;  %vm279_vm3 = vcmp.lt.s32.totalorder %v259_v20, 2 }
  0x1e   :  { %v262_v38 = vshrl.u32 %v620_v27, %v261_v26  ;;  %v264_v39 = vshrl.u32 %v621_v29, %v261_v26  ;;  %v267_v40 = vshrl.u32 %v622_v31, %v261_v26  ;;  %v270_v41 = vshrl.u32 %v623_v33, %v261_v26 }
  0x1f   :  { %v273_v42 = vshrl.u32 %v624_v35, %v261_v26  ;;  %v276_v44 = vshrl.u32 %v625_v43, %v261_v26  ;;  %vm281_vm4 = vcmp.lt.s32.totalorder %v259_v20, 4  ;;  %v39_v48 = vsub.s32 32, %v38_v24 }
  0x20   :  { %v265_v45 = vor.u32 %v264_v39, %v263_v28  ;;  %v268_v46 = vor.u32 %v267_v40, %v266_v30  ;;  %v271_v47 = vor.u32 %v270_v41, %v269_v32  ;;  %vm280_vm5 = vcmp.lt.s32.totalorder %v259_v20, 3 }
  0x21   :  { %v274_v49 = vor.u32 %v273_v42, %v272_v34  ;;  %v277_v50 = vor.u32 %v276_v44, %v275_v36  ;;  %v41_v51 = vshll.u32 %v620_v27, %v38_v24  ;;  %v44_v59 = vshll.u32 %v621_v29, %v38_v24 }
  0x22   :  { %v282_v52 = vsel %vm278_vm2, %v262_v38, %v265_v45  ;;  %v283_v53 = vsel %vm281_vm4, %v271_v47, 2102212464  ;;  %v286_v54 = vsel %vm278_vm2, %v265_v45, %v268_v46  ;;  %v290_v55 = vsel %vm278_vm2, %v268_v46, %v271_v47 }
  0x23   :  { %v284_v56 = vsel %vm280_vm5, %v268_v46, %v283_v53  ;;  %v287_v57 = vsel %vm281_vm4, %v274_v49, 920167782  ;;  %v291_v58 = vsel %vm281_vm4, %v277_v50, 1326507024  ;;  %v40_v62 = vshrl.u32 %v620_v27, %v39_v48 }
  0x24   :  { %v288_v60 = vsel %vm280_vm5, %v271_v47, %v287_v57  ;;  %v292_v61 = vsel %vm280_vm5, %v274_v49, %v291_v58  ;;  %v42_v63 = vshrl.u32 %v621_v29, %v39_v48  ;;  %v285_v0 = vsel %vm279_vm3, %v282_v52, %v284_v56 }
  0x25   :  { %v289_v1 = vsel %vm279_vm3, %v286_v54, %v288_v60  ;;  %v293_v2 = vsel %vm279_vm3, %v290_v55, %v292_v61  ;;  %v45_v6 = vshrl.u32 %v622_v31, %v39_v48  ;;  %v47_v14 = vshll.u32 %v622_v31, %v38_v24 }
  0x26   :  { %v667_v8 = vmul.u32.u64.low %v654_v23, %v293_v2  ;;  %v668_v9 = vmul.u32.u64.high %v654_v23, %v293_v2, %v667_v8  ;;  %v671_v10 = vmul.u32.u64.low %v654_v23, %v289_v1  ;;  %v672_v11 = vmul.u32.u64.high %v654_v23, %v289_v1, %v671_v10 }
  0x27   :  { %v43_v12 = vor.u32 %v42_v63, %v41_v51  ;;  %v46_v13 = vor.u32 %v45_v6, %v44_v59  ;;  %v48_v15 = vshrl.u32 %v623_v33, %v39_v48  ;;  %v50_v16 = vshll.u32 %v623_v33, %v38_v24 }
  0x28   :  { %v51_v17 = vshrl.u32 %v624_v35, %v39_v48  ;;  %v53_v18 = vshll.u32 %v624_v35, %v38_v24  ;;  %v54_v19 = vshrl.u32 %v625_v43, %v39_v48  ;;  %v301_v20 = vmul.u32 %v654_v23, %v285_v0 }
  0x29   :  { %v49_v21 = vor.u32 %v48_v15, %v47_v14  ;;  %vm56_vm6 = vcmp.lt.s32.totalorder %v658_v37, 1  ;;  %vm57_vm7 = vcmp.lt.s32.totalorder %v658_v37, 2  ;;  %vm303_vm8 = vc.u32 %v668_v9, %v671_v10 }
  0x2a   :  { %v304_v22 = vadd.s32 1, %v672_v11  ;;  %v52_v26 = vor.u32 %v51_v17, %v50_v16  ;;  %vm58_vm9 = vcmp.lt.s32.totalorder %v658_v37, 3  ;;  %v55_v27 = vor.u32 %v54_v19, %v53_v18 }
  0x2b   :  { %vm59_vm10 = vcmp.lt.s32.totalorder %v658_v37, 4  ;;  %v60_v28 = vsel %vm56_vm6, %v40_v62, %v43_v12  ;;  %v64_v24 = vsel %vm56_vm6, %v43_v12, %v46_v13  ;;  %v68_v31 = vsel %vm56_vm6, %v46_v13, %v49_v21 }
  0x2c   :  { %v305_v29 = vsel %vm303_vm8, %v304_v22, %v672_v11  ;;  %v61_v23 = vsel %vm59_vm10, %v49_v21, 2102212464  ;;  %v65_v30 = vsel %vm59_vm10, %v52_v26, 920167782  ;;  %v69_v35 = vsel %vm59_vm10, %v55_v27, 1326507024 }
  0x2d   :  { %v306_v32 = vadd.s32 %v305_v29, %v301_v20  ;;  %v62_v33 = vsel %vm58_vm9, %v46_v13, %v61_v23  ;;  %v66_v34 = vsel %vm58_vm9, %v49_v21, %v65_v30  ;;  %v70_v39 = vsel %vm58_vm9, %v52_v26, %v69_v35 }
  0x2e   :  { %v63_v36 = vsel %vm57_vm7, %v60_v28, %v62_v33  ;;  %v67_v38 = vsel %vm57_vm7, %v64_v24, %v66_v34  ;;  %v71_v41 = vsel %vm57_vm7, %v68_v31, %v70_v39  ;;  %v302_v60 = vadd.s32 %v671_v10, %v668_v9 }
  0x2f   :  { %v307_v40 = vadd.s32 536870912, %v306_v32  ;;  %v689_v42 = vmul.u32.u64.low %v656_v25, %v67_v38  ;;  %v690_v43 = vmul.u32.u64.high %v656_v25, %v67_v38, %v689_v42  ;;  %v79_v47 = vmul.u32 %v656_v25, %v63_v36 }
  0x30   :  { %v693_v44 = vmul.u32.u64.low %v656_v25, %v71_v41  ;;  %v694_v45 = vmul.u32.u64.high %v656_v25, %v71_v41, %v693_v44  ;;  %vm338_vm8 = vweird.f32 %v642_v3 }
  0x31   :  { %v308_v46 = vshrl.u32 %v307_v40, 30  ;;  %v82_v49 = vadd.s32 1, %v690_v43 }
  0x32   :  { %vm81_vm11 = vc.u32 %v694_v45, %v689_v42  ;;  %v80_v16 = vadd.s32 %v689_v42, %v694_v45 }
  0x33   :  { %v309_v48 = vshll.u32 %v308_v46, 30  ;;  %v83_v37 = vsel %vm81_vm11, %v82_v49, %v690_v43  ;;  %v332_v27 = vsub.s32 4, %v308_v46 }
  0x34   :  { %v84_v51 = vadd.s32 %v83_v37, %v79_v47 }
  0x35   :  { %v310_v50 = vsub.s32 %v306_v32, %v309_v48  ;;  %v333_v32 = vsel %vm248_vm14, %v332_v27, %v308_v46 }
  0x36   :  { %v85_v53 = vadd.s32 536870912, %v84_v51  ;;  %v335_v35 = vsel %vm247_vm15, 0, %v333_v32 }
  0x37   :  { %v312_v52 = vsub.s32 0, %v310_v50  ;;  %v442_v36 = vadd.s32 3, %v335_v35  ;;  %v339_v41 = vand.u32 3, %v335_v35 }
  0x38   :  { %v86_v55 = vshrl.u32 %v85_v53, 30 }
  0x39   :  { %v539_v54 = vmin.u32 %v312_v52, %v310_v50  ;;  %v443_v42 = vand.u32 3, %v442_v36  ;;  %vm344_vm2 = vcmp.eq.s32.totalorder %v339_v41, 2  ;;  %vm341_vm4 = vcmp.eq.s32.totalorder %v339_v41, 0 }
  0x3a   :  { %v87_v57 = vshll.u32 %v86_v55, 30  ;;  %v110_v38 = vsub.s32 4, %v86_v55  ;;  %vm340_vm6 = vcmp.lt.s32.totalorder %v339_v41, 2 }
  0x3b   :  { %v314_v56 = vclz %v539_v54  ;;  %vm448_vm3 = vcmp.eq.s32.totalorder %v443_v42, 2  ;;  %vm445_vm5 = vcmp.eq.s32.totalorder %v443_v42, 0  ;;  %vm444_vm7 = vcmp.lt.s32.totalorder %v443_v42, 2 }
  0x3c   :  { %v88_v59 = vsub.s32 %v84_v51, %v87_v57  ;;  %v111_v43 = vsel %vm26_vm0, %v110_v38, %v86_v55 }
  0x3d   :  { %v540_v58 = vadd.s32 4294967294, %v314_v56  ;;  %v113_v45 = vsel %vm25_vm1, 0, %v111_v43 }
  0x3e   :  { %v90_v61 = vsub.s32 0, %v88_v59  ;;  %v220_v48 = vadd.s32 3, %v113_v45  ;;  %v117_v54 = vand.u32 3, %v113_v45 }
  0x3f   :  { %vm541_vm12 = vcmp.lt.s32.totalorder %v540_v58, 0 }
  0x40   :  { %v317_v25 = vsel %vm541_vm12, 0, %v540_v58  ;;  %v530_v1 = vmin.u32 %v90_v61, %v88_v59  ;;  %v221_v55 = vand.u32 3, %v220_v48  ;;  %vm122_vm9 = vcmp.eq.s32.totalorder %v117_v54, 2 }
  0x41   :  { %v318_v62 = vsub.s32 32, %v317_v25  ;;  %v319_v63 = vshll.u32 %v310_v50, %v317_v25  ;;  %v322_v0 = vsub.s32 4294967266, %v317_v25  ;;  %v476_v25 = vlaneseq }
  0x42   :  { %v92_v8 = vclz %v530_v1  ;;  %vm226_vm10 = vcmp.eq.s32.totalorder %v221_v55, 2  ;;  %vm118_vm11 = vcmp.lt.s32.totalorder %v117_v54, 2  ;;  %vm119_vm12 = vcmp.eq.s32.totalorder %v117_v54, 0 }
  0x43   :  { %v320_v2 = vshrl.u32 %v302_v60, %v318_v62  ;;  %v323_v6 = vadd.s32 127, %v322_v0 }
  0x44   :  { %v531_v13 = vadd.s32 4294967294, %v92_v8 }
  0x45   :  { %v321_v11 = vor.u32 %v320_v2, %v319_v63  ;;  %v324_v12 = vshll.u32 %v323_v6, 23 }
  0x46   :  { %vm532_vm13 = vcmp.lt.s32.totalorder %v531_v13, 0 }
  0x47   :  { %v325_v14 = vor.u32 4788187, %v324_v12  ;;  %v328_v15 = vcvt.s32.f32 %v321_v11  ;;  %v95_v9 = vsel %vm532_vm13, 0, %v531_v13  ;;  %vm223_vm13 = vcmp.eq.s32.totalorder %v221_v55, 0 }
  0x48   :  { %v96_v10 = vsub.s32 32, %v95_v9  ;;  %v97_v18 = vshll.u32 %v88_v59, %v95_v9  ;;  %v100_v19 = vsub.s32 4294967266, %v95_v9  ;;  %v477_v9 = vshrl.u32 %v476_v25, 7 }
  0x49   :  { %v326_v17 = vand.u32 2147483647, %v325_v14 }
  0x4a   :  { %v98_v21 = vshrl.u32 %v80_v16, %v96_v10  ;;  %v101_v22 = vadd.s32 127, %v100_v19 }
  0x4b   :  { %v329_v20 = vmul.f32 %v328_v15, %v326_v17 }
  0x4c   :  { %v99_v28 = vor.u32 %v98_v21, %v97_v18  ;;  %v102_v24 = vshll.u32 %v101_v22, 23 }
  0x4d   :  { %v330_v26 = vxor.u32 2147483648, %v329_v20 }
  0x4e   :  { %v103_v30 = vor.u32 4788187, %v102_v24  ;;  %v106_v31 = vcvt.s32.f32 %v99_v28 }
  0x4f   :  { %v331_v29 = vsel %vm248_vm14, %v330_v26, %v329_v20  ;;  %vm116_vm14 = vweird.f32 %v644_v4 }
  0x50   :  { %v334_v23 = vsel %vm247_vm15, %v642_v3, %v331_v29  ;;  %v104_v33 = vand.u32 2147483647, %v103_v30  ;;  %vm222_vm15 = vcmp.lt.s32.totalorder %v221_v55, 2 }
  0x51   :  { %566 = vcosq.f32 %v334_v23 }
  0x52   :  { %568 = vsinq.f32 %v334_v23  ;;  %v107_v34 = vmul.f32 %v106_v31, %v104_v33  ;;  %v478_v23 = vsub.s32 0, %v477_v9 }
  0x54   :  { %v108_v5 = vxor.u32 2147483648, %v107_v34 }
  0x56   :  { %v109_v39 = vsel %vm26_vm0, %v108_v5, %v107_v34 }
  0x57   :  { %v112_v40 = vsel %vm25_vm1, %v644_v4, %v109_v39 }
  0x58   :  { %570 = vcosq.f32 %v112_v40 }
  0x59   :  { %572 = vsinq.f32 %v112_v40 }
  0x5e   :  { %v567_v44 = vpop.eup %566 }
  0x5f   :  { %v569_v46 = vpop.eup %568  ;;  %v345_v47 = vxor.u32 2147483648, %v567_v44 }
  0x60   :  { %v342_v7 = vxor.u32 2147483648, %v569_v46 }
  0x61   :  { %v346_v49 = vsel %vm344_vm2, %v345_v47, %v569_v46  ;;  %v450_v50 = vsel %vm448_vm3, %v345_v47, %v569_v46 }
  0x62   :  { %v343_v37 = vsel %vm341_vm4, %v567_v44, %v342_v7  ;;  %v447_v51 = vsel %vm445_vm5, %v567_v44, %v342_v7 }
  0x63   :  { %v347_v52 = vsel %vm340_vm6, %v343_v37, %v346_v49  ;;  %v451_v53 = vsel %vm444_vm7, %v447_v51, %v450_v50 }
  0x64   :  { %v348_v56 = vsel %vm338_vm8, nan, %v347_v52  ;;  %v452_v57 = vsel %vm338_vm8, nan, %v451_v53 }
  0x65   :  { %v453_v58 = vmul.f32 1.4142135, %v348_v56  ;;  %v455_v59 = vadd.f32 %v348_v56, %v348_v56  ;;  %v454_v60 = vmul.f32 1.4142135, %v452_v57  ;;  %v571_v61 = vpop.eup %570 }
  0x66   :  { %v573_v3 = vpop.eup %572  ;;  %v123_v0 = vxor.u32 2147483648, %v571_v61 }
  0x67   :  { %468 = vst [vmem:[#allocation2 + $0x1] sm:$0x1] %v453_v58  ;;  %469 = vst [vmem:[#allocation2 + $0x2] sm:$0x1] %v454_v60  ;;  %v456_v62 = vmul.f32 %v455_v59, %v348_v56  ;;  %v458_v63 = vmul.f32 %v455_v59, %v452_v57  ;;  %v120_v8 = vxor.u32 2147483648, %v573_v3 }
  0x68   :  { %v124_v11 = vsel %vm122_vm9, %v123_v0, %v573_v3  ;;  %v228_v12 = vsel %vm226_vm10, %v123_v0, %v573_v3 }
  0x69   :  { %v546_v1 = vadd.f32 -1.0, %v456_v62  ;;  %v460_v2 = vmul.f32 1.4142135, %v458_v63  ;;  %v463_v6 = vmul.f32 %v458_v63, %v455_v59  ;;  %v121_v16 = vsel %vm119_vm12, %v571_v61, %v120_v8 }
  0x6a   :  { %v125_v17 = vsel %vm118_vm11, %v121_v16, %v124_v11  ;;  %v225_v10 = vsel %vm223_vm13, %v571_v61, %v120_v8 }
  0x6b   :  { %v459_v13 = vmul.f32 1.4142135, %v546_v1  ;;  %471 = vst [vmem:[#allocation2 + $0x4] sm:$0x1] %v460_v2  ;;  %v461_v14 = vmul.f32 %v546_v1, %v455_v59  ;;  %v464_v15 = vsub.f32 %v463_v6, %v452_v57  ;;  %v126_v20 = vsel %vm116_vm14, nan, %v125_v17 }
  0x6c   :  { %v229_v21 = vsel %vm222_vm15, %v225_v10, %v228_v12  ;;  %v233_v22 = vadd.f32 %v126_v20, %v126_v20  ;;  %v231_v29 = vmul.f32 1.4142135, %v126_v20 }
  0x6d   :  { %470 = vst [vmem:[#allocation2 + $0x3] sm:$0x1] %v459_v13  ;;  %v462_v18 = vsub.f32 %v461_v14, %v348_v56  ;;  %v466_v19 = vmul.f32 1.4142135, %v464_v15  ;;  %v230_v26 = vsel %vm116_vm14, nan, %v229_v21 }
  0x6e   :  { %v234_v28 = vmul.f32 %v233_v22, %v126_v20  ;;  %v236_v24 = vmul.f32 %v233_v22, %v230_v26  ;;  %v232_v30 = vmul.f32 1.4142135, %v230_v26  ;;  %v479_v5 = vrot.slane %v231_v29, %v478_v23 }
  0x6f   :  { %v465_v27 = vmul.f32 1.4142135, %v462_v18  ;;  %473 = vst [vmem:[#allocation2 + $0x6] sm:$0x1] %v466_v19 }
  0x70   :  { %v537_v31 = vadd.f32 -1.0, %v234_v28  ;;  %v238_v32 = vmul.f32 1.4142135, %v236_v24  ;;  %v241_v33 = vmul.f32 %v236_v24, %v233_v22  ;;  %v485_v38 = vrot.slane %v232_v30, %v478_v23 }
  0x71   :  { %472 = vst [vmem:[#allocation2 + $0x5] sm:$0x1] %v465_v27 }
  0x72   :  { %v237_v34 = vmul.f32 1.4142135, %v537_v31  ;;  %v239_v35 = vmul.f32 %v537_v31, %v233_v22  ;;  %v242_v36 = vsub.f32 %v241_v33, %v230_v26  ;;  %v497_v39 = vrot.slane %v238_v32, %v478_v23 }
  0x74   :  { %v491_v40 = vrot.slane %v237_v34, %v478_v23  ;;  %v240_v4 = vsub.f32 %v239_v35, %v126_v20  ;;  %v244_v41 = vmul.f32 1.4142135, %v242_v36 }
  0x76   :  { %v243_v43 = vmul.f32 1.4142135, %v240_v4  ;;  %v509_v44 = vrot.slane %v244_v41, %v478_v23 }
  0x78   :  { %v474_v42 = vld [vmem:[#allocation2] sm:$0x7f]  ;;  %v503_v7 = vrot.slane %v243_v43, %v478_v23 }
  0x79   :  { %475 = vst [vmem:[#allocation6] sm:$0x7f] %v474_v42  ;;  %v480_v45 = vmul.f32 %v479_v5, %v474_v42  ;;  %v486_v46 = vmul.f32 %v485_v38, %v474_v42  ;;  %v492_v47 = vmul.f32 %v491_v40, %v474_v42  ;;  %v498_v48 = vmul.f32 %v497_v39, %v474_v42 }
  0x7a   :  { %v510_v49 = vmul.f32 %v509_v44, %v474_v42  ;;  %v504_v50 = vmul.f32 %v503_v7, %v474_v42 }
  0x7b   :  { %481 = vst [vmem:[#allocation6 + $0x7] sm:$0x7f] %v480_v45  ;;  %487 = vst [vmem:[#allocation6 + $0xe] sm:$0x7f] %v486_v46 }
  0x7c   :  { %493 = vst [vmem:[#allocation6 + $0x15] sm:$0x7f] %v492_v47  ;;  %499 = vst [vmem:[#allocation6 + $0x1c] sm:$0x7f] %v498_v48 }
  0x7d   :  { %511 = vst [vmem:[#allocation6 + $0x2a] sm:$0x7f] %v510_v49  ;;  %505 = vst [vmem:[#allocation6 + $0x23] sm:$0x7f] %v504_v50 }
  0x7e   :  { %605 = shalt.err (!%p602_p9)
}
  0x7f   :  { %s627_s13 = smov 128   ;;  %s628_s14 = smov 8  }
  0x80   :  { %523 = dma.vmem_to_hbm [thread:$0]  %s518_s11, 896, %s722_s1, [#allocation5], %s627_s13, %s627_s13, %s628_s14  }
  0x81   :  { %616 = dma.done.wait [#allocation5], 896  }
  0x82   :  { %617 = vsyncadd [#allocation5], 4294966400 }
  0x83   :  { %527 = vsyncpa [#allocation4], 1 }
  0x84   :  { %528 = vsyncpa [#allocation5], 1 }

</bundles_post_ra>
